<compile_context>
chip_gen: v7x
topology: tpu7x:2x2x1
jax: 0.10.0
libtpu: 0.0.40
codegen_flags: <defaults>
</compile_context>

<pallas_src>
import functools
import math

import jax
import jax.numpy as jnp
from jax.experimental import pallas as pl
from jax.experimental.pallas import tpu as pltpu

MASK_VALUE = -2 ** 32 + 1
# Plain Python float: safe to use inline inside the kernel (no captured jax
# Array, no int32 weak-typing overflow).
_MASK_F = float(MASK_VALUE)


def _mlp_attention_kernel(x_ref, w_ref, *rest, has_mask):
    """One tile of b_tile batch rows per grid step.

    x_ref:     (b_tile, L, D)  encoded hiddens (input dtype)
    w_ref:     (1, D)          sent_attention weight, lane-major, f32
    rmask_ref: (b_tile, L)     float mask (only when has_mask)
    out_ref:   (b_tile, D)     pooled sentence representations
    """
    if has_mask:
        rmask_ref, out_ref = rest
    else:
        (out_ref,) = rest

    x = x_ref[...]                                  # (B, L, D), input dtype
    w = w_ref[...].astype(jnp.float32)              # (1, D) f32

    # score[b, l] = sum_d x[b, l, d] * w[d]
    # VPU broadcast-multiply (promoted per-vreg to f32) + lane reduction.
    scores = jnp.sum(x * w[None, :, :], axis=-1)    # (B, L) f32

    if has_mask:
        m = rmask_ref[...].astype(jnp.float32)
        # Exact PyTorch semantics: rmask*score + (1-rmask)*MASK_VALUE.
        scores = m * scores + (1.0 - m) * _MASK_F

    # Numerically stable softmax over the sequence axis (lanes).
    mx = jnp.max(scores, axis=-1, keepdims=True)    # (B, 1)
    e = jnp.exp(scores - mx)                        # (B, L)
    denom = jnp.sum(e, axis=-1, keepdims=True)      # (B, 1)
    p = e * pl.reciprocal(denom, approx=True)       # EUP slot, ~free

    # Weighted sum over the sequence: (B, 1, L) @ (B, L, D) -> (B, 1, D)
    # with f32 accumulation; x is consumed in its native dtype.
    pooled = jnp.einsum(
        "bql,bld->bqd", p[:, None, :].astype(x.dtype), x,
        preferred_element_type=jnp.float32)
    out_ref[...] = pooled[:, 0, :].astype(out_ref.dtype)


def _round_up(x, m):
    return ((x + m - 1) // m) * m


def _vmem_capacity_bytes():
    try:
        return int(pltpu.get_tpu_info().vmem_capacity_bytes)
    except Exception:
        return 64 * 1024 * 1024   # conservative (v7x-sized) fallback


def _pick_b_tile(bs, L, D, itemsize, vmem_limit_bytes):
    """Multi-MiB slab per step, within the per-generation VMEM budget."""
    # ~2 double-buffered x slabs + f32 temporaries + output must fit.
    slab_target = max(1, min(16 * 1024 * 1024, vmem_limit_bytes // 6))
    row_bytes = max(1, L * D * itemsize)
    bt = max(8, (slab_target // row_bytes) // 8 * 8)
    bt = min(bt, _round_up(bs, 8))                  # at most one ragged tile
    if bs > 8:
        # Keep >= 2 grid steps so v7x's two TensorCores both get work.
        bt = min(bt, max(8, _round_up((bs + 1) // 2, 8)))
    return max(bt, 8)


def mlp_attention(encoded_hiddens, attn_weight, rmask=None, *, b_tile=None):
    """encoded_hiddens: [bs, L, D]
       attn_weight:     [1, D]  (nn.Linear(D, 1, bias=False).weight layout)
       rmask:           [bs, L] or None
       returns:         [bs, D]
    """
    bs, L, D = encoded_hiddens.shape
    dtype = encoded_hiddens.dtype
    itemsize = jnp.dtype(dtype).itemsize

    vmem_cap = _vmem_capacity_bytes()
    # v5e/v6e (128 MiB): ~112 MiB; v7x (64 MiB): ~48 MiB; floor at 32 MiB.
    vmem_limit = max(32 * 1024 * 1024,
                     min(vmem_cap - 16 * 1024 * 1024, 112 * 1024 * 1024))

    if b_tile is None:
        b_tile = _pick_b_tile(bs, L, D, itemsize, vmem_limit)

    grid = (pl.cdiv(bs, b_tile),)

    # Weight stays f32 regardless of x dtype (no lossy bf16 round-trip).
    w_row = attn_weight.reshape(1, D).astype(jnp.float32)

    has_mask = rmask is not None
    kernel = functools.partial(_mlp_attention_kernel, has_mask=has_mask)

    in_specs = [
        # x: one (b_tile, L, D) slab per step; last two dims are the full
        # array dims, so no (8,128) padding of the array is needed.
        pl.BlockSpec((b_tile, L, D), lambda b: (b, 0, 0)),
        # Shared lane-major weight, same block every step.
        pl.BlockSpec((1, D), lambda b: (0, 0)),
    ]
    args = [encoded_hiddens, w_row]
    bytes_accessed = bs * L * D * itemsize + D * 4 + bs * D * itemsize
    if has_mask:
        rmask = rmask.astype(jnp.float32)
        in_specs.append(pl.BlockSpec((b_tile, L), lambda b: (b, 0)))
        args.append(rmask)
        bytes_accessed += bs * L * 4

    cost = pl.CostEstimate(flops=4 * bs * L * D,
                           transcendentals=bs * L,
                           bytes_accessed=bytes_accessed)

    out = pl.pallas_call(
        kernel,
        out_shape=jax.ShapeDtypeStruct((bs, D), dtype),
        grid=grid,
        in_specs=in_specs,
        out_specs=pl.BlockSpec((b_tile, D), lambda b: (b, 0)),
        compiler_params=pltpu.CompilerParams(
            dimension_semantics=("parallel",),
            vmem_limit_bytes=vmem_limit,
        ),
        cost_estimate=cost,
    )(*args)
    return out


def mlp_attention_reference(encoded_hiddens, attn_weight, rmask=None):
    """Pure-JAX reference mirroring the PyTorch forward (eval mode)."""
    hp = jax.lax.Precision.HIGHEST
    scores = jnp.einsum("bld,d->bl", encoded_hiddens, attn_weight.reshape(-1),
                        precision=hp)
    if rmask is not None:
        scores = rmask * scores + (1.0 - rmask) * _MASK_F
    p = jax.nn.softmax(scores, axis=-1)
    return jnp.einsum("bl,bld->bd", p, encoded_hiddens, precision=hp)


if __name__ == "__main__":
    key = jax.random.PRNGKey(0)
    bs, max_len, input_dim = 2, 8, 32

    k_x, k_w = jax.random.split(key)
    x = jax.random.normal(k_x, (bs, max_len, input_dim), dtype=jnp.float32)

    # Deterministic init of nn.Linear(input_dim, 1, bias=False).weight: [1, D]
    bound = 1.0 / math.sqrt(input_dim)
    attn_weight = jax.random.uniform(
        k_w, (1, input_dim), minval=-bound, maxval=bound, dtype=jnp.float32)

    # mask: second sequence has its last 3 positions masked out
    rmask = jnp.ones((bs, max_len), dtype=jnp.float32)
    rmask = rmask.at[1, 5:].set(0.0)

    out = jax.block_until_ready(mlp_attention(x, attn_weight, rmask))
    ref = mlp_attention_reference(x, attn_weight, rmask)
    assert out.shape == (bs, input_dim)
    assert jnp.allclose(out, ref, atol=5e-3, rtol=5e-3), "mismatch vs reference"

    # No-mask path (dedicated mask-free kernel variant).
    out_nm = jax.block_until_ready(mlp_attention(x, attn_weight, None))
    ref_nm = mlp_attention_reference(x, attn_weight, None)
    assert jnp.allclose(out_nm, ref_nm, atol=5e-3, rtol=5e-3), "mismatch (no mask)"

    print("KERNEL_OK")
</pallas_src>

<mosaic_0001>
module attributes {stable_mosaic.version = 11 : i64} {
  func.func @_mlp_attention_kernel(%arg0: i32, %arg1: memref<8x8x32xf32, #tpu.memory_space<vmem>>, %arg2: memref<1x32xf32, #tpu.memory_space<vmem>>, %arg3: memref<8x8xf32, #tpu.memory_space<vmem>>, %arg4: memref<8x32xf32, #tpu.memory_space<vmem>>) attributes {dimension_semantics = [#tpu.dimension_semantics<parallel>], iteration_bounds = array<i64: 1>, scalar_prefetch = 0 : i64, scratch_operands = 0 : i64, tpu.core_type = #tpu.core_type<tc>, window_params = [{transform_indices = @transform_0, window_bounds = array<i64: 8, 8, 32>}, {pipeline_mode = #tpu.pipeline_mode<synchronous>, transform_indices = @transform_1, window_bounds = array<i64: 1, 32>}, {transform_indices = @transform_2, window_bounds = array<i64: 8, 8>}, {transform_indices = @transform_3, window_bounds = array<i64: 8, 32>}]} {
    %c0 = arith.constant 0 : index
    %c0_0 = arith.constant 0 : index
    %c0_1 = arith.constant 0 : index
    %0 = vector.load %arg1[%c0, %c0_0, %c0_1] : memref<8x8x32xf32, #tpu.memory_space<vmem>>, vector<8x8x32xf32>
    %c0_2 = arith.constant 0 : index
    %c0_3 = arith.constant 0 : index
    %1 = vector.load %arg2[%c0_2, %c0_3] : memref<1x32xf32, #tpu.memory_space<vmem>>, vector<1x32xf32>
    %2 = vector.shape_cast %1 : vector<1x32xf32> to vector<1x1x32xf32>
    %3 = vector.broadcast %2 : vector<1x1x32xf32> to vector<8x8x32xf32>
    %4 = arith.mulf %0, %3 : vector<8x8x32xf32>
    %cst = arith.constant dense<0.000000e+00> : vector<8x8xf32>
    %5 = vector.multi_reduction <add>, %4, %cst [2] : vector<8x8x32xf32> to vector<8x8xf32>
    %c0_4 = arith.constant 0 : index
    %c0_5 = arith.constant 0 : index
    %6 = vector.load %arg3[%c0_4, %c0_5] : memref<8x8xf32, #tpu.memory_space<vmem>>, vector<8x8xf32>
    %7 = arith.mulf %6, %5 : vector<8x8xf32>
    %cst_6 = arith.constant 1.000000e+00 : f32
    %8 = vector.broadcast %cst_6 : f32 to vector<8x8xf32>
    %9 = arith.subf %8, %6 : vector<8x8xf32>
    %cst_7 = arith.constant -4.2949673E+9 : f32
    %10 = vector.broadcast %cst_7 : f32 to vector<8x8xf32>
    %11 = arith.mulf %9, %10 : vector<8x8xf32>
    %12 = arith.addf %7, %11 : vector<8x8xf32>
    %cst_8 = arith.constant dense<0xFF800000> : vector<8xf32>
    %13 = vector.multi_reduction <maximumf>, %12, %cst_8 [1] : vector<8x8xf32> to vector<8xf32>
    %14 = vector.shape_cast %13 : vector<8xf32> to vector<8x1xf32>
    %15 = vector.broadcast %14 : vector<8x1xf32> to vector<8x8xf32>
    %16 = arith.subf %12, %15 : vector<8x8xf32>
    %17 = math.exp %16 : vector<8x8xf32>
    %cst_9 = arith.constant dense<0.000000e+00> : vector<8xf32>
    %18 = vector.multi_reduction <add>, %17, %cst_9 [1] : vector<8x8xf32> to vector<8xf32>
    %19 = vector.shape_cast %18 : vector<8xf32> to vector<8x1xf32>
    %20 = tpu.reciprocal %19 {approx = true} : vector<8x1xf32> -> vector<8x1xf32>
    %21 = vector.broadcast %20 : vector<8x1xf32> to vector<8x8xf32>
    %22 = arith.mulf %17, %21 : vector<8x8xf32>
    %23 = vector.shape_cast %22 : vector<8x8xf32> to vector<8x1x8xf32>
    "tpu.trace_start"() <{level = 10 : i32, message = "bql,bld->bqd"}> : () -> ()
    %cst_10 = arith.constant dense<0.000000e+00> : vector<8x1x32xf32>
    %24 = tpu.matmul %23, %0, %cst_10 {dimension_numbers = #tpu.dot_dimension_numbers<[2], [1], [1], [2], [0, 0, 0, 1, 1, 2], [0], [0]>} : vector<8x1x8xf32>, vector<8x8x32xf32>, vector<8x1x32xf32> -> vector<8x1x32xf32>
    "tpu.trace_stop"() : () -> ()
    %25 = vector.shape_cast %24 : vector<8x1x32xf32> to vector<8x32xf32>
    %c0_11 = arith.constant 0 : index
    %c0_12 = arith.constant 0 : index
    %26 = vector.load %arg4[%c0_11, %c0_12] : memref<8x32xf32, #tpu.memory_space<vmem>>, vector<8x32xf32>
    tpu.vector_store %arg4[%c0_11, %c0_12], %25 {strides = array<i32>} : memref<8x32xf32, #tpu.memory_space<vmem>>, vector<8x32xf32>,
    return
  }
  func.func @transform_0(%arg0: i32) -> (i32, i32, i32) {
    %c0_i32 = arith.constant 0 : i32
    %c0_i32_0 = arith.constant 0 : i32
    %c0_i32_1 = arith.constant 0 : i32
    return %arg0, %c0_i32, %c0_i32_0 : i32, i32, i32
  }
  func.func @transform_1(%arg0: i32) -> (i32, i32) {
    %c0_i32 = arith.constant 0 : i32
    %c0_i32_0 = arith.constant 0 : i32
    %c0_i32_1 = arith.constant 0 : i32
    return %c0_i32, %c0_i32_0 : i32, i32
  }
  func.func @transform_2(%arg0: i32) -> (i32, i32) {
    %c0_i32 = arith.constant 0 : i32
    %c0_i32_0 = arith.constant 0 : i32
    return %arg0, %c0_i32 : i32, i32
  }
  func.func @transform_3(%arg0: i32) -> (i32, i32) {
    %c0_i32 = arith.constant 0 : i32
    %c0_i32_0 = arith.constant 0 : i32
    return %arg0, %c0_i32 : i32, i32
  }
}

</mosaic_0001>

<bundles_post_ra>
// kernel: tpu_custom_call.1
= control target key start
LH: loop header
LB: loop body
LE: loop exit
PB: predicated region body
PF: predicated region fallthrough
CT: control target
= control target key end

     0   :  { %8 = vsyncpa [#allocation3], 0  ;;  %s1076_s0 = inlined_call_operand.hbm [shape: f32[2,8,32], index: 0, kind: input, shape index: {}]   ;;  %s1077_s1 = inlined_call_operand.vmem [shape: f32[1,32], index: 1, kind: input, shape index: {}]   ;;  %s1078_s2 = inlined_call_operand.vmem [shape: f32[2,8], index: 2, kind: input, shape index: {}]   ;;  %s1079_s3 = inlined_call_operand.hbm [shape: f32[2,32], index: 3, kind: output, shape index: {}]  }
   0x1   :  { %9 = vsyncpa [#allocation4], 0 }
   0x2   :  { %14 = vsyncadd [#allocation3], 768  ;;  %s944_s12 = smov [#allocation2]   ;;  %s896_s16 = scalar_lea.hbm %s1076_s0, 256 }
   0x3   :  { %s15_s13 = sshll.u32 %s944_s12, 4  ;;  %p897_p0 = scmp.ne.s32.totalorder %s1076_s0, %s896_s16  ;;  %s16_s13 = int_to_ptr.vmem [resolvable:$true] %s15_s13 }
   0x4   :  { %p900_p1 = scmp.lt.u32.totalorder %s896_s16, %s1076_s0 }
   0x6   :  { %p902_p2 = pnand %p900_p1, %p897_p0 }
   0x8   :  { %905 = shalt.err (!%p902_p2)
}
   0x9   :  { %s906_s21 = scalar_lea.vmem %s16_s13, 256  ;;  %s910_s22 = scalar_lea.vmem %s16_s13, 1024 }
   0xa   :  { %p907_p3 = scmp.ne.s32.totalorder %s16_s13, %s906_s21  ;;  %p911_p4 = scmp.lt.s32.totalorder %s16_s13, %s16_s13 }
   0xb   :  { %p912_p5 = scmp.lt.s32.totalorder %s910_s22, %s906_s21 }
   0xd   :  { %p913_p6 = por %p912_p5, %p911_p4 }
   0xf   :  { %p914_p7 = pnand %p913_p6, %p907_p3 }
  0x11   :  { %917 = shalt.err (!%p914_p7)
}
  0x12   :  { %s945_s23 = smov 128   ;;  %s946_s24 = smov 8  }
  0x13   :  { %21 = dma.hbm_to_vmem [thread:$0]  %s1076_s0, 256, %s16_s13, [#allocation3], %s945_s23, %s945_s23, %s946_s24  }
  0x14   :  { %940 = dma.done.wait [#allocation3], 1024  }
  0x15   :  { %941 = vsyncadd [#allocation3], 4294966272  ;;  %v985_v0 = vld [vmem:[#allocation2] sm:$0xff]  ;;  %vm52_vm0 = vcmask 261120   ;;  %v990_v2 = vld [vmem:[#allocation2 + $0x10] sm:$0xff]  ;;  %v86_v25 = vlaneseq  ;;  %vm120_vm1 = vcmask 1041409  }
  0x16   :  { %v818_v1 = vld [vmem:[%s1077_s1] ss:$0 sm:$0xff]  ;;  %v994_v5 = vld [vmem:[#allocation2 + $0x8] sm:$0xff]  ;;  %v996_v6 = vld [vmem:[#allocation2 + $0x18] sm:$0xff]  ;;  %vm122_vm2 = vcmask 1042434   ;;  %vm124_vm3 = vcmask 1043459  }
  0x17   :  { %v44_v3 = vmul.f32 %v818_v1, %v985_v0  ;;  %v46_v4 = vmul.f32 %v818_v1, %v990_v2  ;;  %v45_v7 = vmul.f32 %v818_v1, %v994_v5  ;;  %v47_v8 = vmul.f32 %v818_v1, %v996_v6  ;;  %v1000_v9 = vld [vmem:[#allocation2 + $0x20] sm:$0xff]  ;;  %v1002_v10 = vld [vmem:[#allocation2 + $0x28] sm:$0xff]  ;;  %v1010_v17 = vld [vmem:[#allocation2 + $0x30] sm:$0xff] }
  0x18   :  { %v48_v15 = vmul.f32 %v818_v1, %v1000_v9  ;;  %v49_v16 = vmul.f32 %v818_v1, %v1002_v10  ;;  %v1012_v18 = vld [vmem:[#allocation2 + $0x38] sm:$0xff]  ;;  %v50_v21 = vmul.f32 %v818_v1, %v1010_v17  ;;  %v87_v26 = vand.u32 127, %v86_v25  ;;  %v77_v41 = vld [vmem:[%s1078_s2] sm:$0xff] }
  0x19   :  { %v53_v11 = vsel %vm52_vm0, %v44_v3, 0.0  ;;  %v59_v12 = vsel %vm52_vm0, %v46_v4, 0.0  ;;  %v56_v13 = vsel %vm52_vm0, %v45_v7, 0.0  ;;  %v62_v14 = vsel %vm52_vm0, %v47_v8, 0.0 }
  0x1a   :  { %54 = vadd.xlane.f32.xlu0 %v53_v11  ;;  %60 = vadd.xlane.f32.xlu1 %v59_v12  ;;  %v65_v19 = vsel %vm52_vm0, %v48_v15, 0.0  ;;  %v68_v20 = vsel %vm52_vm0, %v49_v16, 0.0  ;;  %v51_v22 = vmul.f32 %v818_v1, %v1012_v18  ;;  %v71_v23 = vsel %vm52_vm0, %v50_v21, 0.0 }
  0x1b   :  { %v89_v27 = vshrl.u32 %v86_v25, 7  ;;  %vm126_vm4 = vcmask 1044484   ;;  %vm128_vm5 = vcmask 1045509   ;;  %v136_v46 = vsub.f32 1.0, %v77_v41 }
  0x1c   :  { %v74_v24 = vsel %vm52_vm0, %v51_v22, 0.0  ;;  %vm130_vm6 = vcmask 1046534   ;;  %vm132_vm7 = vcmask 1047559   ;;  %vm139_vm8 = vcmask 64512  }
  0x1d   :  { %v90_v30 = vsub.s32 %v87_v26, %v89_v27  ;;  %v137_v53 = vmul.f32 -4.2949673e+09, %v136_v46  ;;  %v947_v63 = vmov 0.0   ;;  %vm948_vm9 = vmmov 0  }
  0x1e   :  { %57 = vadd.xlane.f32.xlu0 %v56_v13  ;;  %63 = vadd.xlane.f32.xlu1 %v62_v14  ;;  %v949_v3 = vmov 1966171168  }
  0x1f   :  { %843 = vmatprep.subr.mxu0 %v947_v63  ;;  %845 = vmatprep.mubr.msk.f32.mxu0 %vm948_vm9, %v947_v63  ;;  %v154_v4 = vunpack.c.l.s4 %v949_v3 }
  0x20   :  { %844 = vmatpush3.msra.mxu0 %v985_v0  ;;  %848 = vmatprep.subr.mxu1 %v947_v63 }
  0x21   :  { %849 = vmatpush3.msra.mxu1 %v994_v5  ;;  %853 = vmatprep.subr.mxu0 %v947_v63  ;;  %v155_v7 = vunpack.c.0.s8 %v154_v4 }
  0x22   :  { %66 = vadd.xlane.f32.xlu0 %v65_v19  ;;  %69 = vadd.xlane.f32.xlu1 %v68_v20 }
  0x23   :  { %850 = vmatprep.mubr.msk.f32.mxu1 %vm948_vm9, %v947_v63  ;;  %858 = vmatprep.subr.mxu1 %v947_v63  ;;  %v158_v8 = vsub.s32 %v155_v7, %v89_v27 }
  0x26   :  { %72 = vadd.xlane.f32.xlu0 %v71_v23  ;;  %75 = vadd.xlane.f32.xlu1 %v74_v24 }
  0xa7   :  { %v55_v28 = vpop.xlane.xlu0 %54  ;;  %v61_v29 = vpop.xlane.xlu1 %60 }
  0xa8   :  { %v91_v33 = vrot.slane %v55_v28, %v90_v30  ;;  %v99_v36 = vrot.slane %v61_v29, %v90_v30 }
  0xab   :  { %v58_v31 = vpop.xlane.xlu0 %57  ;;  %v64_v32 = vpop.xlane.xlu1 %63 }
  0xac   :  { %v95_v34 = vrot.slane %v58_v31, %v90_v30  ;;  %v103_v35 = vrot.slane %v64_v32, %v90_v30 }
  0xae   :  { %v121_v37 = vsel %vm120_vm1, %v95_v34, %v91_v33 }
  0xaf   :  { %v123_v38 = vsel %vm122_vm2, %v99_v36, %v121_v37  ;;  %v67_v39 = vpop.xlane.xlu0 %66  ;;  %v70_v40 = vpop.xlane.xlu1 %69 }
  0xb0   :  { %v125_v42 = vsel %vm124_vm3, %v103_v35, %v123_v38  ;;  %v107_v43 = vrot.slane %v67_v39, %v90_v30  ;;  %v111_v44 = vrot.slane %v70_v40, %v90_v30 }
  0xb2   :  { %v127_v45 = vsel %vm126_vm4, %v107_v43, %v125_v42 }
  0xb3   :  { %v73_v47 = vpop.xlane.xlu0 %72  ;;  %v76_v48 = vpop.xlane.xlu1 %75  ;;  %v129_v51 = vsel %vm128_vm5, %v111_v44, %v127_v45 }
  0xb4   :  { %v115_v49 = vrot.slane %v73_v47, %v90_v30  ;;  %v119_v50 = vrot.slane %v76_v48, %v90_v30 }
  0xb6   :  { %v131_v52 = vsel %vm130_vm6, %v115_v49, %v129_v51 }
  0xb7   :  { %v133_v54 = vsel %vm132_vm7, %v119_v50, %v131_v52 }
  0xb8   :  { %v135_v55 = vmul.f32 %v133_v54, %v77_v41 }
  0xba   :  { %v138_v56 = vadd.f32 %v137_v53, %v135_v55 }
  0xbc   :  { %v140_v57 = vsel %vm139_vm8, %v138_v56, -inf }
  0xbd   :  { %141 = vmax.xlane.f32.xlu0 %v140_v57 }
 0x14a   :  { %v142_v58 = vpop.xlane.xlu0 %141 }
 0x14b   :  { %v143_v59 = vsub.f32 %v138_v56, %v142_v58 }
 0x14d   :  { %v144_v60 = vmul.f32 1.442695, %v143_v59 }
 0x14f   :  { %892 = vpow2.f32 %v144_v60 }
 0x159   :  { %v893_v61 = vpop.eup %892 }
 0x15a   :  { %v146_v62 = vsel %vm139_vm8, %v893_v61, 0.0 }
 0x15b   :  { %147 = vadd.xlane.f32.xlu1 %v146_v62 }
 0x1e8   :  { %v148_v1 = vpop.xlane.xlu1 %147 }
 0x1e9   :  { %894 = vrcp.f32 %v148_v1 }
 0x1f3   :  { %v895_v11 = vpop.eup %894 }
 0x1f4   :  { %v150_v12 = vmul.f32 %v895_v11, %v893_v61 }
 0x1f6   :  { %v152_v13 = vcombine.high %v150_v12, %v150_v12  ;;  %v159_v14 = vrot.slane %v150_v12, %v158_v8 }
 0x1f8   :  { %v175_v15 = vrot.slane %v159_v14, %v158_v8  ;;  %v167_v16 = vcombine.high %v159_v14, %v159_v14  ;;  %v166_v5 = vrot.slane %v152_v13, %v158_v8 }
 0x1fa   :  { %846 = vmatmul.mubr.msk.f32.vlgmr.msra.gmra.mrb[0].mxu0 %vm139_vm8, %v175_v15  ;;  %v189_v0 = vrot.slane %v167_v16, %v158_v8  ;;  %v197_v19 = vcombine.high %v175_v15, %v175_v15  ;;  %v168_v21 = vcombine.high %v166_v5, %v166_v5 }
 0x1fb   :  { %854 = vmatpush3.msra.mxu0 %v990_v2  ;;  %855 = vmatprep.mubr.msk.f32.mxu0 %vm948_vm9, %v947_v63  ;;  %v182_v2 = vrot.slane %v166_v5, %v158_v8 }
 0x1fc   :  { %851 = vmatmul.mubr.msk.f32.vlgmr.msra.gmra.mrb[0].mxu1 %vm139_vm8, %v189_v0  ;;  %863 = vmatprep.subr.mxu0 %v947_v63  ;;  %v199_v20 = vcombine.high %v189_v0, %v189_v0 }
 0x1fd   :  { %859 = vmatpush3.msra.mxu1 %v996_v6  ;;  %860 = vmatprep.mubr.msk.f32.mxu1 %vm948_vm9, %v947_v63  ;;  %v196_v6 = vrot.slane %v168_v21, %v158_v8 }
 0x1fe   :  { %856 = vmatmul.mubr.msk.f32.vlgmr.msra.gmra.mrb[2].mxu0 %vm139_vm8, %v197_v19  ;;  %868 = vmatprep.subr.mxu1 %v947_v63 }
 0x1ff   :  { %864 = vmatpush3.msra.mxu0 %v1000_v9  ;;  %865 = vmatprep.mubr.msk.f32.mxu0 %vm948_vm9, %v947_v63  ;;  %v198_v9 = vcombine.high %v182_v2, %v182_v2 }
 0x200   :  { %861 = vmatmul.mubr.msk.f32.vlgmr.msra.gmra.mrb[2].mxu1 %vm139_vm8, %v199_v20  ;;  %873 = vmatprep.subr.mxu0 %v947_v63 }
 0x201   :  { %869 = vmatpush3.msra.mxu1 %v1002_v10  ;;  %870 = vmatprep.mubr.msk.f32.mxu1 %vm948_vm9, %v947_v63  ;;  %v200_v10 = vcombine.high %v196_v6, %v196_v6 }
 0x202   :  { %866 = vmatmul.mubr.msk.f32.vlgmr.msra.gmra.mrb[4].mxu0 %vm139_vm8, %v182_v2  ;;  %878 = vmatprep.subr.mxu1 %v947_v63 }
 0x203   :  { %874 = vmatpush3.msra.mxu0 %v1010_v17  ;;  %875 = vmatprep.mubr.msk.f32.mxu0 %vm948_vm9, %v947_v63 }
 0x204   :  { %871 = vmatmul.mubr.msk.f32.vlgmr.msra.gmra.mrb[4].mxu1 %vm139_vm8, %v196_v6 }
 0x205   :  { %879 = vmatpush3.msra.mxu1 %v1012_v18  ;;  %880 = vmatprep.mubr.msk.f32.mxu1 %vm948_vm9, %v947_v63 }
 0x206   :  { %876 = vmatmul.mubr.msk.f32.vlgmr.msra.gmra.mrb[6].mxu0 %vm139_vm8, %v198_v9 }
 0x208   :  { %881 = vmatmul.mubr.msk.f32.vlgmr.msra.gmra.mrb[6].mxu1 %vm139_vm8, %v200_v10 }
 0x2cd   :  { %v269_v22 = vpop.f32.mrb[0].mxu0 }
 0x2ce   :  { %v847_v23 = vpop.f32.mrb[1].mxu0 }
 0x2cf   :  { %v341_v24 = vpop.f32.mrb[0].mxu1 }
 0x2d0   :  { %v785_v25 = vrot.slane %v341_v24, 7  ;;  %v852_v26 = vpop.f32.mrb[1].mxu1 }
 0x2d1   :  { %v413_v17 = vpop.f32.mrb[2].mxu0 }
 0x2d2   :  { %v786_v27 = vsel %vm120_vm1, %v785_v25, %v269_v22  ;;  %v787_v28 = vrot.slane %v413_v17, 6  ;;  %v857_v29 = vpop.f32.mrb[3].mxu0 }
 0x2d3   :  { %v485_v30 = vpop.f32.mrb[2].mxu1 }
 0x2d4   :  { %v788_v18 = vsel %vm122_vm2, %v787_v28, %v786_v27  ;;  %v789_v31 = vrot.slane %v485_v30, 5  ;;  %v862_v32 = vpop.f32.mrb[3].mxu1 }
 0x2d5   :  { %v557_v33 = vpop.f32.mrb[4].mxu0 }
 0x2d6   :  { %v790_v34 = vsel %vm124_vm3, %v789_v31, %v788_v18  ;;  %v791_v35 = vrot.slane %v557_v33, 4  ;;  %v867_v36 = vpop.f32.mrb[5].mxu0 }
 0x2d7   :  { %v629_v37 = vpop.f32.mrb[4].mxu1 }
 0x2d8   :  { %v792_v38 = vsel %vm126_vm4, %v791_v35, %v790_v34  ;;  %v793_v39 = vrot.slane %v629_v37, 3  ;;  %v872_v40 = vpop.f32.mrb[5].mxu1 }
 0x2d9   :  { %v701_v41 = vpop.f32.mrb[6].mxu0 }
 0x2da   :  { %v794_v42 = vsel %vm128_vm5, %v793_v39, %v792_v38  ;;  %v795_v43 = vrot.slane %v701_v41, 2  ;;  %v877_v44 = vpop.f32.mrb[7].mxu0 }
 0x2db   :  { %v773_v45 = vpop.f32.mrb[6].mxu1 }
 0x2dc   :  { %v796_v46 = vsel %vm130_vm6, %v795_v43, %v794_v42  ;;  %v797_v47 = vrot.slane %v773_v45, 1  ;;  %v882_v48 = vpop.f32.mrb[7].mxu1 }
 0x2de   :  { %v798_v49 = vsel %vm132_vm7, %v797_v47, %v796_v46 }
 0x2df   :  { %800 = vst.msk [vmem:[#allocation5] sm:$0xff] %vm52_vm0, %v798_v49 }
 0x2e0   :  { %805 = vsyncadd [#allocation4], 96  ;;  %s950_s2 = smov [#allocation5]  }
 0x2e1   :  { %s806_s29 = sshll.u32 %s950_s2, 4  ;;  %s807_s29 = int_to_ptr.vmem [resolvable:$true] %s806_s29 }
 0x2e2   :  { %s918_s30 = scalar_lea.vmem %s807_s29, 32  ;;  %s922_s4 = scalar_lea.vmem %s807_s29, 128 }
 0x2e3   :  { %p919_p8 = scmp.ne.s32.totalorder %s807_s29, %s918_s30  ;;  %p923_p9 = scmp.lt.s32.totalorder %s807_s29, %s807_s29 }
 0x2e4   :  { %p924_p10 = scmp.lt.s32.totalorder %s922_s4, %s918_s30 }
 0x2e6   :  { %p925_p11 = por %p924_p10, %p923_p9 }
 0x2e8   :  { %p926_p12 = pnand %p925_p11, %p919_p8 }
 0x2ea   :  { %929 = shalt.err (!%p926_p12)
}
 0x2eb   :  { %s930_s7 = scalar_lea.hbm %s1079_s3, 32 }
 0x2ec   :  { %p931_p13 = scmp.ne.s32.totalorder %s1079_s3, %s930_s7  ;;  %p934_p0 = scmp.lt.u32.totalorder %s930_s7, %s1079_s3 }
 0x2ee   :  { %p936_p1 = pnand %p934_p0, %p931_p13 }
 0x2f0   :  { %939 = shalt.err (!%p936_p1)
}
 0x2f1   :  { %s951_s12 = smov 32   ;;  %s952_s13 = smov 2  }
 0x2f2   :  { %812 = dma.vmem_to_hbm [thread:$0]  %s807_s29, 32, %s1079_s3, [#allocation4], %s951_s12, %s951_s12, %s952_s13  }
 0x2f3   :  { %942 = dma.done.wait [#allocation4], 128  }
 0x2f4   :  { %943 = vsyncadd [#allocation4], 4294967168 }
 0x2f5   :  { %816 = vsyncpa [#allocation3], 1 }
 0x2f6   :  { %817 = vsyncpa [#allocation4], 1 }

</bundles_post_ra>
